<compile_context>
chip_gen: v6e
topology: v6e:2x2x1
jax: 0.10.0
libtpu: 0.0.40
codegen_flags: <defaults>
</compile_context>

<pallas_src>
import math

import jax
import jax.numpy as jnp
from jax.experimental import pallas as pl
from jax.experimental.pallas import tpu as pltpu  # noqa: F401  (TPU backend)

# ---------------- configuration (small, consistent with the module) -----------
B, S, D = 2, 8, 32          # batch, seq_len, d_model
H, DK, DV = 4, 8, 8         # num_heads, key_query_dimension, value_dimension
FF = 64                     # dim_feedforward
N = B * S                   # total tokens processed in one invocation
EPS = 1e-5                  # PyTorch LayerNorm default eps
NEG = -1e30                 # masking value (softmax-equivalent to -inf)

HD = H * D                  # 128 packed score-weight columns (A_0..A_3)
HDV = H * DV                # 32  packed value columns        (Wv_0..Wv_3)
PROJ = HD + HDV             # 160 width of the fused projection matmul
OFF_WO = PROJ               # Wo columns inside the packed weight slab
OFF_W1 = PROJ + D           # W1 columns inside the packed weight slab


def _layer_norm(x, gamma, beta):
    mu = jnp.mean(x, axis=-1, keepdims=True)
    xc = x - mu
    var = jnp.mean(xc * xc, axis=-1, keepdims=True)
    return xc * jax.lax.rsqrt(var + EPS) * gamma + beta


# ------------------------------- Pallas kernel --------------------------------
def rel_transformer_kernel(xb_ref, wbig_ref, w2v_ref, out_ref):
    # xb_ref  : (N, D + N)   = [ x (N,D) | additive attention bias (N,N) ]
    #                          bias encodes the key mask AND blocks cross-batch
    #                          attention pairs (0 or NEG).
    # wbig_ref: (D, 256)     = [ A_packed (D,128) | Wv_packed (D,32)
    #                            | Wo (32,32) | W1 (D,64) ]
    #                          A_h = (Wq_h^T Wk_h)/sqrt(DK)  (scale pre-folded).
    # w2v_ref : (FF+4, FF)   = [ W2 (64,32) zero-padded ; b1 ; b2 ; ln_g ; ln_b ]
    xb = xb_ref[...]
    x = xb[:, :D]                                    # (N, D)
    bias = xb[:, D:D + N]                            # (N, N)

    wbig = wbig_ref[...]
    w2v = w2v_ref[...]

    # one shared transpose of x (keys arrive pre-transposed for every head)
    xT = x.T                                         # (D, N)

    # --- single lane-dense projection:  [ x·A_0 .. x·A_3 | x·Wv_0 .. x·Wv_3 ] ---
    proj = jnp.dot(x, wbig[:, :PROJ],
                   preferred_element_type=jnp.float32)       # (N, 160)
    v2d = proj[:, HD:PROJ]                                   # (N, H*DV) heads on lanes

    # --- per-head scores, transpose-free:  scores_h = (x·A_h) @ x^T ---
    score_blocks = []
    for h in range(H):
        s = jnp.dot(proj[:, h * D:(h + 1) * D], xT,
                    preferred_element_type=jnp.float32)      # (N, N)
        score_blocks.append(s + bias)
    scores = jnp.concatenate(score_blocks, axis=0)           # (H*N, N) batched softmax

    # --- softmax over keys (exact reciprocal; clamp guards all-masked rows) ---
    m = jnp.max(scores, axis=-1, keepdims=True)
    e = jnp.exp(scores - m)
    denom = jnp.maximum(jnp.sum(e, axis=-1, keepdims=True), 1e-30)
    probs = e / denom                                        # (H*N, N)

    # --- context per head, assembled lane-dense as (N, H*DV) ---
    ctx_blocks = []
    for h in range(H):
        p_h = probs[h * N:(h + 1) * N, :]                    # (N, N)
        v_h = v2d[:, h * DV:(h + 1) * DV]                    # (N, DV)
        ctx_blocks.append(jnp.dot(p_h, v_h,
                                  preferred_element_type=jnp.float32))
    ctx = jnp.concatenate(ctx_blocks, axis=1)                # (N, H*DV) = (16, 32)

    # --- single output-projection matmul ---
    wo = wbig[:, OFF_WO:OFF_WO + D]                          # (H*DV, D)
    attn = jnp.dot(ctx, wo, preferred_element_type=jnp.float32)   # (N, D)

    # --- unpack FFN / LayerNorm params from the consolidated slabs ---
    w1 = wbig[:, OFF_W1:OFF_W1 + FF]                         # (D, FF)
    w2 = w2v[:FF, :D]                                        # (FF, D)
    b1 = w2v[FF:FF + 1, :]                                   # (1, FF)
    b2 = w2v[FF + 1:FF + 2, :D]                              # (1, D)
    g1 = w2v[FF + 2:FF + 3, :D]                              # (1, D)
    bt1 = w2v[FF + 3:FF + 4, :D]                             # (1, D)

    # --- residual + postnorm (norm1) ---
    x1 = _layer_norm(x + attn, g1, bt1)

    # --- feed-forward (relu) + residual + postnorm ---
    h1 = jnp.maximum(
        jnp.dot(x1, w1, preferred_element_type=jnp.float32) + b1, 0.0)
    ff = jnp.dot(h1, w2, preferred_element_type=jnp.float32) + b2
    # NOTE: reproduces the PyTorch code exactly — the second post-norm uses norm1.
    x2 = _layer_norm(x1 + ff, g1, bt1)

    out_ref[...] = x2.astype(out_ref.dtype)


# --------------------------------- wrapper -------------------------------------
def rel_transformer_layer(src, src_mask, edges, edge_types, params):
    """Forward pass of RelationalTransformerEncoderLayer (config documented above)."""
    if edges.shape[0] != 0:
        # TODO(synk): sparse edge-type attention/value biases (scatter over a dynamic
        # edge list) are not implemented in this kernel (num_edge_types=0 config).
        raise NotImplementedError("sparse edges not supported in this kernel")

    # ---- weight packing (would be done once at init in a real deployment) ----
    w = params["wqkv"].reshape(H, 2 * DK + DV, D)            # (H, 2DK+DV, D)
    wq = w[:, :DK, :]                                        # (H, DK, D)
    wk = w[:, DK:2 * DK, :]                                  # (H, DK, D)
    wv = w[:, 2 * DK:, :]                                    # (H, DV, D)

    # Fold the score bilinear form + 1/sqrt(DK) scale:  A_h = Wq_h^T Wk_h / sqrt(DK)
    a = jnp.einsum('hkd,hke->hde', wq, wk) * (1.0 / math.sqrt(DK))   # (H, D, D)
    a_packed = jnp.transpose(a, (1, 0, 2)).reshape(D, HD)            # (D, H*D)
    wv_packed = jnp.transpose(wv, (2, 0, 1)).reshape(D, HDV)         # (D, H*DV)
    wo = params["wo"].T                                              # (H*DV, D)
    w1 = params["w1"].T                                              # (D, FF)
    wbig = jnp.concatenate([a_packed, wv_packed, wo, w1], axis=1)    # (D, 256)

    # W2 + all bias/LayerNorm vectors consolidated into one small slab.
    w2v = jnp.zeros((FF + 4, FF), jnp.float32)                       # (68, 64)
    w2v = w2v.at[:FF, :D].set(params["w2"].T)
    w2v = w2v.at[FF, :FF].set(params["b1"])
    w2v = w2v.at[FF + 1, :D].set(params["b2"])
    w2v = w2v.at[FF + 2, :D].set(params["ln1_g"])
    w2v = w2v.at[FF + 3, :D].set(params["ln1_b"])

    # Additive attention bias over the flattened token axis:
    #   0   for (query, key) in the same batch element with an unmasked key,
    #   NEG otherwise (masked key or cross-batch pair).
    tok_batch = jnp.arange(N, dtype=jnp.int32) // S
    same_batch = tok_batch[:, None] == tok_batch[None, :]            # (N, N)
    key_ok = jnp.logical_not(src_mask).reshape(1, N)                 # (1, N)
    bias = jnp.where(jnp.logical_and(same_batch, key_ok), 0.0, NEG)
    bias = bias.astype(jnp.float32)                                  # (N, N)

    xb = jnp.concatenate([src.reshape(N, D).astype(jnp.float32), bias], axis=1)

    out = pl.pallas_call(
        rel_transformer_kernel,
        out_shape=jax.ShapeDtypeStruct((N, D), jnp.float32),
        # No grid: the whole (tiny) problem runs as one invocation with the three
        # consolidated operands resident in VMEM as full arrays.
    )(xb, wbig, w2v)

    return out.reshape(B, S, D)


# --------------------------- pure-JAX reference --------------------------------
def reference_forward(src, src_mask, params):
    kqv = src @ params["wqkv"].T                                 # (B,S,H*(2DK+DV))
    kqv = kqv.reshape(B, S, H, 2 * DK + DV)
    q, k, v = kqv[..., :DK], kqv[..., DK:2 * DK], kqv[..., 2 * DK:]
    scores = jnp.einsum("bqhd,bkhd->bqkh", q, k) / math.sqrt(DK)
    scores = jnp.where(src_mask[:, None, :, None], NEG, scores)
    probs = jax.nn.softmax(scores, axis=2)
    ctx = jnp.einsum("bqkh,bkhv->bqhv", probs, v).reshape(B, S, H * DV)
    attn = ctx @ params["wo"].T
    x1 = _layer_norm(src + attn, params["ln1_g"], params["ln1_b"])
    ff = jnp.maximum(x1 @ params["w1"].T + params["b1"], 0.0) @ params["w2"].T + params["b2"]
    return _layer_norm(x1 + ff, params["ln1_g"], params["ln1_b"])   # norm1 re-used


# ------------------------------------ main --------------------------------------
if __name__ == "__main__":
    key = jax.random.PRNGKey(0)
    keys = jax.random.split(key, 8)

    params = {
        "wqkv": 0.05 * jax.random.normal(keys[0], (H * (2 * DK + DV), D), jnp.float32),
        "wo":   0.05 * jax.random.normal(keys[1], (D, H * DV), jnp.float32),
        "w1":   0.05 * jax.random.normal(keys[2], (FF, D), jnp.float32),
        "b1":   0.05 * jax.random.normal(keys[3], (FF,), jnp.float32),
        "w2":   0.05 * jax.random.normal(keys[4], (D, FF), jnp.float32),
        "b2":   0.05 * jax.random.normal(keys[5], (D,), jnp.float32),
        "ln1_g": jnp.ones((D,), jnp.float32),
        "ln1_b": jnp.zeros((D,), jnp.float32),
    }

    src = jax.random.normal(keys[6], (B, S, D), jnp.float32)
    src_mask = jnp.zeros((B, S), dtype=bool).at[1, -2:].set(True)  # mask last 2 keys of batch 1
    edges = jnp.zeros((0, 3), dtype=jnp.int32)                     # sparse edges unused
    edge_types = jnp.zeros((0,), dtype=jnp.int32)

    out = rel_transformer_layer(src, src_mask, edges, edge_types, params)
    out = jax.block_until_ready(out)

    ref = reference_forward(src, src_mask, params)
    assert out.shape == (B, S, D)
    # Tolerance covers MXU accumulation-order differences vs the XLA reference
    # (softmax reciprocal is now exact).
    assert jnp.allclose(out, ref, rtol=2e-3, atol=2e-3), "mismatch vs JAX reference"

    print("KERNEL_OK")
</pallas_src>

<mosaic_0001>
module attributes {stable_mosaic.version = 11 : i64} {
  func.func @rel_transformer_kernel(%arg0: memref<16x48xf32, #tpu.memory_space<vmem>>, %arg1: memref<32x256xf32, #tpu.memory_space<vmem>>, %arg2: memref<68x64xf32, #tpu.memory_space<vmem>>, %arg3: memref<16x32xf32, #tpu.memory_space<vmem>>) attributes {dimension_semantics = [], scalar_prefetch = 0 : i64, scratch_operands = 0 : i64, tpu.core_type = #tpu.core_type<tc>} {
    %c0 = arith.constant 0 : index
    %c0_0 = arith.constant 0 : index
    %0 = vector.load %arg0[%c0, %c0_0] : memref<16x48xf32, #tpu.memory_space<vmem>>, vector<16x48xf32>
    %1 = vector.extract_strided_slice %0 {offsets = [0, 0], sizes = [16, 32], strides = [1, 1]} : vector<16x48xf32> to vector<16x32xf32>
    %2 = vector.extract_strided_slice %0 {offsets = [0, 32], sizes = [16, 16], strides = [1, 1]} : vector<16x48xf32> to vector<16x16xf32>
    %c0_1 = arith.constant 0 : index
    %c0_2 = arith.constant 0 : index
    %3 = vector.load %arg1[%c0_1, %c0_2] : memref<32x256xf32, #tpu.memory_space<vmem>>, vector<32x256xf32>
    %c0_3 = arith.constant 0 : index
    %c0_4 = arith.constant 0 : index
    %4 = vector.load %arg2[%c0_3, %c0_4] : memref<68x64xf32, #tpu.memory_space<vmem>>, vector<68x64xf32>
    %5 = tpu.transpose %1, [1, 0] : vector<16x32xf32> -> vector<32x16xf32>
    %6 = vector.extract_strided_slice %3 {offsets = [0, 0], sizes = [32, 160], strides = [1, 1]} : vector<32x256xf32> to vector<32x160xf32>
    %cst = arith.constant dense<0.000000e+00> : vector<16x160xf32>
    %7 = tpu.matmul %1, %6, %cst {dimension_numbers = #tpu.dot_dimension_numbers<[1], [0], [0], [1], [0, 0, 1, 1], [], []>} : vector<16x32xf32>, vector<32x160xf32>, vector<16x160xf32> -> vector<16x160xf32>
    %8 = vector.extract_strided_slice %7 {offsets = [0, 128], sizes = [16, 32], strides = [1, 1]} : vector<16x160xf32> to vector<16x32xf32>
    %9 = vector.extract_strided_slice %7 {offsets = [0, 0], sizes = [16, 32], strides = [1, 1]} : vector<16x160xf32> to vector<16x32xf32>
    %cst_5 = arith.constant dense<0.000000e+00> : vector<16x16xf32>
    %10 = tpu.matmul %9, %5, %cst_5 {dimension_numbers = #tpu.dot_dimension_numbers<[1], [0], [0], [1], [0, 0, 1, 1], [], []>} : vector<16x32xf32>, vector<32x16xf32>, vector<16x16xf32> -> vector<16x16xf32>
    %11 = arith.addf %10, %2 : vector<16x16xf32>
    %12 = vector.extract_strided_slice %7 {offsets = [0, 32], sizes = [16, 32], strides = [1, 1]} : vector<16x160xf32> to vector<16x32xf32>
    %cst_6 = arith.constant dense<0.000000e+00> : vector<16x16xf32>
    %13 = tpu.matmul %12, %5, %cst_6 {dimension_numbers = #tpu.dot_dimension_numbers<[1], [0], [0], [1], [0, 0, 1, 1], [], []>} : vector<16x32xf32>, vector<32x16xf32>, vector<16x16xf32> -> vector<16x16xf32>
    %14 = arith.addf %13, %2 : vector<16x16xf32>
    %15 = vector.extract_strided_slice %7 {offsets = [0, 64], sizes = [16, 32], strides = [1, 1]} : vector<16x160xf32> to vector<16x32xf32>
    %cst_7 = arith.constant dense<0.000000e+00> : vector<16x16xf32>
    %16 = tpu.matmul %15, %5, %cst_7 {dimension_numbers = #tpu.dot_dimension_numbers<[1], [0], [0], [1], [0, 0, 1, 1], [], []>} : vector<16x32xf32>, vector<32x16xf32>, vector<16x16xf32> -> vector<16x16xf32>
    %17 = arith.addf %16, %2 : vector<16x16xf32>
    %18 = vector.extract_strided_slice %7 {offsets = [0, 96], sizes = [16, 32], strides = [1, 1]} : vector<16x160xf32> to vector<16x32xf32>
    %cst_8 = arith.constant dense<0.000000e+00> : vector<16x16xf32>
    %19 = tpu.matmul %18, %5, %cst_8 {dimension_numbers = #tpu.dot_dimension_numbers<[1], [0], [0], [1], [0, 0, 1, 1], [], []>} : vector<16x32xf32>, vector<32x16xf32>, vector<16x16xf32> -> vector<16x16xf32>
    %20 = arith.addf %19, %2 : vector<16x16xf32>
    %21 = tpu.concatenate %11, %14, %17, %20 in 0 : vector<16x16xf32>, vector<16x16xf32>, vector<16x16xf32>, vector<16x16xf32> -> vector<64x16xf32>
    %cst_9 = arith.constant dense<0xFF800000> : vector<64xf32>
    %22 = vector.multi_reduction <maximumf>, %21, %cst_9 [1] : vector<64x16xf32> to vector<64xf32>
    %23 = vector.shape_cast %22 : vector<64xf32> to vector<64x1xf32>
    %24 = vector.broadcast %23 : vector<64x1xf32> to vector<64x16xf32>
    %25 = arith.subf %21, %24 : vector<64x16xf32>
    %26 = math.exp %25 : vector<64x16xf32>
    %cst_10 = arith.constant dense<0.000000e+00> : vector<64xf32>
    %27 = vector.multi_reduction <add>, %26, %cst_10 [1] : vector<64x16xf32> to vector<64xf32>
    %28 = vector.shape_cast %27 : vector<64xf32> to vector<64x1xf32>
    %cst_11 = arith.constant 1.000000e-30 : f32
    %29 = vector.broadcast %cst_11 : f32 to vector<64x1xf32>
    %30 = arith.maximumf %28, %29 : vector<64x1xf32>
    %31 = vector.broadcast %30 : vector<64x1xf32> to vector<64x16xf32>
    %32 = arith.divf %26, %31 : vector<64x16xf32>
    %33 = vector.extract_strided_slice %32 {offsets = [0, 0], sizes = [16, 16], strides = [1, 1]} : vector<64x16xf32> to vector<16x16xf32>
    %34 = vector.extract_strided_slice %8 {offsets = [0, 0], sizes = [16, 8], strides = [1, 1]} : vector<16x32xf32> to vector<16x8xf32>
    %cst_12 = arith.constant dense<0.000000e+00> : vector<16x8xf32>
    %35 = tpu.matmul %33, %34, %cst_12 {dimension_numbers = #tpu.dot_dimension_numbers<[1], [0], [0], [1], [0, 0, 1, 1], [], []>} : vector<16x16xf32>, vector<16x8xf32>, vector<16x8xf32> -> vector<16x8xf32>
    %36 = vector.extract_strided_slice %32 {offsets = [16, 0], sizes = [16, 16], strides = [1, 1]} : vector<64x16xf32> to vector<16x16xf32>
    %37 = vector.extract_strided_slice %8 {offsets = [0, 8], sizes = [16, 8], strides = [1, 1]} : vector<16x32xf32> to vector<16x8xf32>
    %cst_13 = arith.constant dense<0.000000e+00> : vector<16x8xf32>
    %38 = tpu.matmul %36, %37, %cst_13 {dimension_numbers = #tpu.dot_dimension_numbers<[1], [0], [0], [1], [0, 0, 1, 1], [], []>} : vector<16x16xf32>, vector<16x8xf32>, vector<16x8xf32> -> vector<16x8xf32>
    %39 = vector.extract_strided_slice %32 {offsets = [32, 0], sizes = [16, 16], strides = [1, 1]} : vector<64x16xf32> to vector<16x16xf32>
    %40 = vector.extract_strided_slice %8 {offsets = [0, 16], sizes = [16, 8], strides = [1, 1]} : vector<16x32xf32> to vector<16x8xf32>
    %cst_14 = arith.constant dense<0.000000e+00> : vector<16x8xf32>
    %41 = tpu.matmul %39, %40, %cst_14 {dimension_numbers = #tpu.dot_dimension_numbers<[1], [0], [0], [1], [0, 0, 1, 1], [], []>} : vector<16x16xf32>, vector<16x8xf32>, vector<16x8xf32> -> vector<16x8xf32>
    %42 = vector.extract_strided_slice %32 {offsets = [48, 0], sizes = [16, 16], strides = [1, 1]} : vector<64x16xf32> to vector<16x16xf32>
    %43 = vector.extract_strided_slice %8 {offsets = [0, 24], sizes = [16, 8], strides = [1, 1]} : vector<16x32xf32> to vector<16x8xf32>
    %cst_15 = arith.constant dense<0.000000e+00> : vector<16x8xf32>
    %44 = tpu.matmul %42, %43, %cst_15 {dimension_numbers = #tpu.dot_dimension_numbers<[1], [0], [0], [1], [0, 0, 1, 1], [], []>} : vector<16x16xf32>, vector<16x8xf32>, vector<16x8xf32> -> vector<16x8xf32>
    %45 = tpu.concatenate %35, %38, %41, %44 in 1 : vector<16x8xf32>, vector<16x8xf32>, vector<16x8xf32>, vector<16x8xf32> -> vector<16x32xf32>
    %46 = vector.extract_strided_slice %3 {offsets = [0, 160], sizes = [32, 32], strides = [1, 1]} : vector<32x256xf32> to vector<32x32xf32>
    %cst_16 = arith.constant dense<0.000000e+00> : vector<16x32xf32>
    %47 = tpu.matmul %45, %46, %cst_16 {dimension_numbers = #tpu.dot_dimension_numbers<[1], [0], [0], [1], [0, 0, 1, 1], [], []>} : vector<16x32xf32>, vector<32x32xf32>, vector<16x32xf32> -> vector<16x32xf32>
    %48 = vector.extract_strided_slice %3 {offsets = [0, 192], sizes = [32, 64], strides = [1, 1]} : vector<32x256xf32> to vector<32x64xf32>
    %49 = vector.extract_strided_slice %4 {offsets = [0, 0], sizes = [64, 32], strides = [1, 1]} : vector<68x64xf32> to vector<64x32xf32>
    %50 = vector.extract_strided_slice %4 {offsets = [64, 0], sizes = [1, 64], strides = [1, 1]} : vector<68x64xf32> to vector<1x64xf32>
    %51 = vector.extract_strided_slice %4 {offsets = [65, 0], sizes = [1, 32], strides = [1, 1]} : vector<68x64xf32> to vector<1x32xf32>
    %52 = vector.extract_strided_slice %4 {offsets = [66, 0], sizes = [1, 32], strides = [1, 1]} : vector<68x64xf32> to vector<1x32xf32>
    %53 = vector.extract_strided_slice %4 {offsets = [67, 0], sizes = [1, 32], strides = [1, 1]} : vector<68x64xf32> to vector<1x32xf32>
    %54 = arith.addf %1, %47 : vector<16x32xf32>
    %cst_17 = arith.constant dense<0.000000e+00> : vector<16xf32>
    %55 = vector.multi_reduction <add>, %54, %cst_17 [1] : vector<16x32xf32> to vector<16xf32>
    %56 = vector.shape_cast %55 : vector<16xf32> to vector<16x1xf32>
    %cst_18 = arith.constant 3.200000e+01 : f32
    %57 = vector.broadcast %cst_18 : f32 to vector<16x1xf32>
    %58 = arith.divf %56, %57 : vector<16x1xf32>
    %59 = vector.broadcast %58 : vector<16x1xf32> to vector<16x32xf32>
    %60 = arith.subf %54, %59 : vector<16x32xf32>
    %61 = arith.mulf %60, %60 : vector<16x32xf32>
    %cst_19 = arith.constant dense<0.000000e+00> : vector<16xf32>
    %62 = vector.multi_reduction <add>, %61, %cst_19 [1] : vector<16x32xf32> to vector<16xf32>
    %63 = vector.shape_cast %62 : vector<16xf32> to vector<16x1xf32>
    %cst_20 = arith.constant 3.200000e+01 : f32
    %64 = vector.broadcast %cst_20 : f32 to vector<16x1xf32>
    %65 = arith.divf %63, %64 : vector<16x1xf32>
    %cst_21 = arith.constant 9.99999974E-6 : f32
    %66 = vector.broadcast %cst_21 : f32 to vector<16x1xf32>
    %67 = arith.addf %65, %66 : vector<16x1xf32>
    %68 = math.rsqrt %67 : vector<16x1xf32>
    %69 = vector.broadcast %68 : vector<16x1xf32> to vector<16x32xf32>
    %70 = arith.mulf %60, %69 : vector<16x32xf32>
    %71 = vector.broadcast %52 : vector<1x32xf32> to vector<16x32xf32>
    %72 = arith.mulf %70, %71 : vector<16x32xf32>
    %73 = vector.broadcast %53 : vector<1x32xf32> to vector<16x32xf32>
    %74 = arith.addf %72, %73 : vector<16x32xf32>
    %cst_22 = arith.constant dense<0.000000e+00> : vector<16x64xf32>
    %75 = tpu.matmul %74, %48, %cst_22 {dimension_numbers = #tpu.dot_dimension_numbers<[1], [0], [0], [1], [0, 0, 1, 1], [], []>} : vector<16x32xf32>, vector<32x64xf32>, vector<16x64xf32> -> vector<16x64xf32>
    %76 = vector.broadcast %50 : vector<1x64xf32> to vector<16x64xf32>
    %77 = arith.addf %75, %76 : vector<16x64xf32>
    %cst_23 = arith.constant 0.000000e+00 : f32
    %78 = vector.broadcast %cst_23 : f32 to vector<16x64xf32>
    %79 = arith.maximumf %77, %78 : vector<16x64xf32>
    %cst_24 = arith.constant dense<0.000000e+00> : vector<16x32xf32>
    %80 = tpu.matmul %79, %49, %cst_24 {dimension_numbers = #tpu.dot_dimension_numbers<[1], [0], [0], [1], [0, 0, 1, 1], [], []>} : vector<16x64xf32>, vector<64x32xf32>, vector<16x32xf32> -> vector<16x32xf32>
    %81 = vector.broadcast %51 : vector<1x32xf32> to vector<16x32xf32>
    %82 = arith.addf %80, %81 : vector<16x32xf32>
    %83 = arith.addf %74, %82 : vector<16x32xf32>
    %cst_25 = arith.constant dense<0.000000e+00> : vector<16xf32>
    %84 = vector.multi_reduction <add>, %83, %cst_25 [1] : vector<16x32xf32> to vector<16xf32>
    %85 = vector.shape_cast %84 : vector<16xf32> to vector<16x1xf32>
    %cst_26 = arith.constant 3.200000e+01 : f32
    %86 = vector.broadcast %cst_26 : f32 to vector<16x1xf32>
    %87 = arith.divf %85, %86 : vector<16x1xf32>
    %88 = vector.broadcast %87 : vector<16x1xf32> to vector<16x32xf32>
    %89 = arith.subf %83, %88 : vector<16x32xf32>
    %90 = arith.mulf %89, %89 : vector<16x32xf32>
    %cst_27 = arith.constant dense<0.000000e+00> : vector<16xf32>
    %91 = vector.multi_reduction <add>, %90, %cst_27 [1] : vector<16x32xf32> to vector<16xf32>
    %92 = vector.shape_cast %91 : vector<16xf32> to vector<16x1xf32>
    %cst_28 = arith.constant 3.200000e+01 : f32
    %93 = vector.broadcast %cst_28 : f32 to vector<16x1xf32>
    %94 = arith.divf %92, %93 : vector<16x1xf32>
    %cst_29 = arith.constant 9.99999974E-6 : f32
    %95 = vector.broadcast %cst_29 : f32 to vector<16x1xf32>
    %96 = arith.addf %94, %95 : vector<16x1xf32>
    %97 = math.rsqrt %96 : vector<16x1xf32>
    %98 = vector.broadcast %97 : vector<16x1xf32> to vector<16x32xf32>
    %99 = arith.mulf %89, %98 : vector<16x32xf32>
    %100 = vector.broadcast %52 : vector<1x32xf32> to vector<16x32xf32>
    %101 = arith.mulf %99, %100 : vector<16x32xf32>
    %102 = vector.broadcast %53 : vector<1x32xf32> to vector<16x32xf32>
    %103 = arith.addf %101, %102 : vector<16x32xf32>
    %c0_30 = arith.constant 0 : index
    %c0_31 = arith.constant 0 : index
    %104 = vector.load %arg3[%c0_30, %c0_31] : memref<16x32xf32, #tpu.memory_space<vmem>>, vector<16x32xf32>
    tpu.vector_store %arg3[%c0_30, %c0_31], %103 {strides = array<i32>} : memref<16x32xf32, #tpu.memory_space<vmem>>, vector<16x32xf32>,
    return
  }
}

</mosaic_0001>

<bundles_post_ra>
// kernel: tpu_custom_call.1
= control target key start
LH: loop header
LB: loop body
LE: loop exit
PB: predicated region body
PF: predicated region fallthrough
CT: control target
= control target key end

     0   :  { %v1557_v4 = vmov 0.0   ;;  %vm34_vm0 = vcmask 261120   ;;  %s1836_s0 = inlined_call_operand.vmem [shape: f32[16,48], index: 0, kind: input, shape index: {}]   ;;  %s1837_s1 = inlined_call_operand.vmem [shape: f32[32,256], index: 1, kind: input, shape index: {}]   ;;  %s1838_s2 = inlined_call_operand.vmem [shape: f32[68,64], index: 2, kind: input, shape index: {}]   ;;  %s1839_s3 = inlined_call_operand.hbm [shape: f32[16,32], index: 3, kind: output, shape index: {}]  }
   0x1   :  { %v1592_v0 = vld [vmem:[%s1837_s1 + $0x38] sm:$0xff]  ;;  %v23_v1 = vld [vmem:[%s1837_s1 + $0x30] sm:$0xff]  ;;  %v1600_v2 = vld [vmem:[%s1837_s1 + $0x28] sm:$0xff]  ;;  %105 = vmatprep.mubr.f32.mxu1 %v1557_v4 }
   0x2   :  { %65 = vmatprep.subr.mxu1 %v1592_v0  ;;  %v21_v3 = vld [vmem:[%s1837_s1 + $0x20] sm:$0xff]  ;;  %v1609_v5 = vld [vmem:[%s1837_s1 + $0x18] sm:$0xff]  ;;  %v19_v6 = vld [vmem:[%s1837_s1 + $0x10] sm:$0xff] }
   0x3   :  { %66 = vmatpush1.msra.mxu1 %v23_v1  ;;  %v1618_v7 = vld [vmem:[%s1836_s0 + $0x8] sm:$0xff] }
   0x4   :  { %67 = vmatprep.subr.mxu1 %v1600_v2 }
   0x5   :  { %8 = vsyncpa [#allocation3], 0  ;;  %68 = vmatpush1.msra.mxu1 %v21_v3  ;;  %v1623_v8 = vld [vmem:[%s1837_s1 + $0x8] sm:$0xff]  ;;  %1393 = vmatprep.subr.msk.mxu0 %vm34_vm0, %v1618_v7  ;;  %v17_v9 = vld [vmem:[%s1837_s1] sm:$0xff]  ;;  %s1559_s1 = smov 96   ;;  %s1560_s5 = smov 32  }
   0x6   :  { %69 = vmatprep.subr.mxu1 %v1609_v5  ;;  %v1634_v10 = vld [vmem:[%s1836_s0] sm:$0xff]  ;;  %1394 = vmatpush3.xpose.msk.msra.mxu0 %vm34_vm0, %v1618_v7  ;;  %s1558_s0 = smov 64   ;;  %vm454_vm1 = vcmask 130048   ;;  %s1561_s6 = smov 120   ;;  %vm919_vm2 = vcmask 64512   ;;  %vm924_vm3 = vcmask 195584  }
   0x7   :  { %70 = vmatpush1.msra.mxu1 %v19_v6  ;;  %1395 = vmatprep.subr.msk.mxu0 %vm34_vm0, %v1634_v10  ;;  %s1562_s7 = smov 112   ;;  %s1563_s8 = smov 104   ;;  %vm1168_vm4 = vcmask 523264  }
   0x8   :  { %71 = vmatprep.subr.mxu1 %v1623_v8  ;;  %s1564_s9 = smov 8   ;;  %s1565_s10 = smov 16  }
   0x9   :  { %72 = vmatpush1.msra.mxu1 %v17_v9  ;;  %s1566_s11 = smov 24  }
   0xa   :  { %1300 = vmatmul.mubr.msk.f32.vlgmr.msra.gmra.mxu1 %vm34_vm0, %v1634_v10  ;;  %1386 = vmatprep.subr.msk.mxu1 %vm34_vm0, %v1618_v7 }
   0xb   :  { %111 = vmatprep.mubr.f32.mxu1 %v1557_v4  ;;  %1387 = vmatpush3.xpose.msk.msra.mxu1 %vm34_vm0, %v1618_v7 }
   0xc   :  { %1388 = vmatprep.subr.msk.mxu1 %vm34_vm0, %v1634_v10  ;;  %1396 = vmatpush3.xpose.msk.msra.mxu0 %vm34_vm0, %v1634_v10 }
   0xd   :  { %1407 = vmatprep.subr.msk.mxu0 %vm34_vm0, %v1618_v7 }
   0xe   :  { %1301 = vmatmul.mubr.msk.f32.gmra.mxu1 %vm34_vm0, %v1618_v7 }
   0xf   :  { %1389 = vmatpush3.xpose.msk.msra.mxu1 %vm34_vm0, %v1634_v10 }
  0x10   :  { %1400 = vmatprep.subr.msk.mxu1 %vm34_vm0, %v1618_v7 }
  0xca   :  { %v107_v11 = vpop.f32.mrf.mxu1 }
  0xcb   :  { %288 = vrot.lane.b32.xlu1 %v107_v11, %s1558_s0  ;;  %205 = vrot.lane.b32.xlu0 %v107_v11, %s1559_s1 }
  0xcc   :  { %1390 = vmatprep.mubr.msk.f32.mxu1 %vm34_vm0, %v107_v11  ;;  %v1662_v12 = vpop.f32.mrf.mxu1 }
  0xce   :  { %v113_v13 = vpop.f32.mrf.mxu1 }
  0xcf   :  { %290 = vrot.lane.b32.xlu1 %v113_v13, %s1558_s0  ;;  %207 = vrot.lane.b32.xlu0 %v113_v13, %s1559_s1 }
  0xd0   :  { %1391 = vmatmul.mubr.msk.f32.vlgmr.msra.gmra.mxu1 %vm34_vm0, %v113_v13  ;;  %v1671_v14 = vpop.f32.mrf.mxu1 }
  0xd1   :  { %1401 = vmatpush3.xpose.msk.msra.mxu1 %vm34_vm0, %v1618_v7 }
  0xd2   :  { %1402 = vmatprep.subr.msk.mxu1 %vm34_vm0, %v1634_v10 }
  0xd3   :  { %373 = vrot.lane.b32.xlu1 %v113_v13, %s1560_s5  ;;  %371 = vrot.lane.b32.xlu0 %v107_v11, %s1560_s5 }
  0xd5   :  { %1403 = vmatpush3.xpose.msk.msra.mxu1 %vm34_vm0, %v1634_v10 }
  0xd6   :  { %1414 = vmatprep.subr.mxu1 %v1671_v14 }
  0xd7   :  { %120 = vrot.lane.b32.xlu1 %v1618_v7, %s1559_s1  ;;  %118 = vrot.lane.b32.xlu0 %v1634_v10, %s1559_s1 }
 0x13d   :  { %v289_v15 = vpop.permute.xlu1 %288  ;;  %v206_v16 = vpop.permute.xlu0 %205 }
 0x13e   :  { %1397 = vmatprep.mubr.msk.f32.mxu0 %vm34_vm0, %v206_v16  ;;  %1404 = vmatprep.mubr.msk.f32.mxu1 %vm34_vm0, %v289_v15 }
 0x141   :  { %v291_v17 = vpop.permute.xlu1 %290  ;;  %v208_v18 = vpop.permute.xlu0 %207 }
 0x142   :  { %1398 = vmatmul.mubr.msk.f32.vlgmr.msra.gmra.mxu0 %vm34_vm0, %v208_v18  ;;  %1405 = vmatmul.mubr.msk.f32.vlgmr.msra.gmra.mxu1 %vm34_vm0, %v291_v17 }
 0x143   :  { %1408 = vmatpush3.xpose.msk.msra.mxu0 %vm34_vm0, %v1618_v7  ;;  %1415 = vmatpush3.msra.mxu1 %v1671_v14 }
 0x144   :  { %1416 = vmatprep.subr.mxu1 %v1662_v12  ;;  %1409 = vmatprep.subr.msk.mxu0 %vm34_vm0, %v1634_v10 }
 0x145   :  { %1417 = vmatpush3.msra.mxu1 %v1662_v12  ;;  %v372_v19 = vpop.permute.xlu0 %371  ;;  %v374_v20 = vpop.permute.xlu1 %373 }
 0x146   :  { %1411 = vmatprep.mubr.msk.f32.mxu0 %vm34_vm0, %v372_v19 }
 0x147   :  { %1410 = vmatpush3.xpose.msk.msra.mxu0 %vm34_vm0, %v1634_v10 }
 0x149   :  { %v121_v21 = vpop.permute.xlu1 %120  ;;  %v119_v23 = vpop.permute.xlu0 %118 }
 0x14a   :  { %1412 = vmatmul.mubr.msk.f32.vlgmr.msra.gmra.mxu0 %vm34_vm0, %v374_v20 }
 0x190   :  { %v1392_v22 = vpop.f32.mrf.mxu1 }
 0x191   :  { %v202_v24 = vadd.f32 %v1392_v22, %v121_v21 }
 0x192   :  { %v196_v25 = vpop.f32.mrf.mxu1 }
 0x193   :  { %v197_v26 = vadd.f32 %v196_v25, %v119_v23  ;;  %v458_v27 = vsel %vm454_vm1, %v202_v24, -inf }
 0x194   :  { %459 = vmax.xlane.f32.xlu1 %v458_v27 }
 0x195   :  { %v455_v28 = vsel %vm454_vm1, %v197_v26, -inf }
 0x196   :  { %456 = vmax.xlane.f32.xlu0 %v455_v28 }
 0x202   :  { %v1399_v29 = vpop.f32.mrf.mxu0  ;;  %v1406_v30 = vpop.f32.mrf.mxu1 }
 0x203   :  { %v285_v31 = vadd.f32 %v1399_v29, %v121_v21  ;;  %v368_v38 = vadd.f32 %v1406_v30, %v121_v21 }
 0x204   :  { %v279_v32 = vpop.f32.mrf.mxu0  ;;  %v362_v33 = vpop.f32.mrf.mxu1 }
 0x205   :  { %v280_v34 = vadd.f32 %v279_v32, %v119_v23  ;;  %v363_v35 = vadd.f32 %v362_v33, %v119_v23  ;;  %v464_v36 = vsel %vm454_vm1, %v285_v31, -inf  ;;  %v470_v44 = vsel %vm454_vm1, %v368_v38, -inf }
 0x206   :  { %465 = vmax.xlane.f32.xlu0 %v464_v36 }
 0x207   :  { %v467_v37 = vsel %vm454_vm1, %v363_v35, -inf  ;;  %v461_v39 = vsel %vm454_vm1, %v280_v34, -inf }
 0x208   :  { %468 = vmax.xlane.f32.xlu1 %v467_v37 }
 0x20a   :  { %v1413_v40 = vpop.f32.mrf.mxu0  ;;  %462 = vmax.xlane.f32.xlu0 %v461_v39 }
 0x20b   :  { %v451_v42 = vadd.f32 %v1413_v40, %v121_v21 }
 0x20c   :  { %v445_v41 = vpop.f32.mrf.mxu0 }
 0x20d   :  { %v446_v43 = vadd.f32 %v445_v41, %v119_v23  ;;  %v476_v46 = vsel %vm454_vm1, %v451_v42, -inf }
 0x20e   :  { %471 = vmax.xlane.f32.xlu0 %v470_v44 }
 0x20f   :  { %v473_v45 = vsel %vm454_vm1, %v446_v43, -inf }
 0x210   :  { %474 = vmax.xlane.f32.xlu1 %v473_v45 }
 0x212   :  { %477 = vmax.xlane.f32.xlu0 %v476_v46 }
 0x21d   :  { %v460_v47 = vpop.xlane.xlu1 %459 }
 0x21e   :  { %v480_v48 = vsub.f32 %v202_v24, %v460_v47 }
 0x21f   :  { %v457_v49 = vpop.xlane.xlu0 %456 }
 0x220   :  { %v489_v50 = vmul.f32 1.442695, %v480_v48  ;;  %v479_v51 = vsub.f32 %v197_v26, %v457_v49 }
 0x221   :  { %636 = vrot.lane.b32.xlu1 %v1671_v14, %s1561_s6 }
 0x222   :  { %1495 = vpow2.f32 %v489_v50  ;;  %v487_v52 = vmul.f32 1.442695, %v479_v51 }
 0x224   :  { %1497 = vpow2.f32 %v487_v52 }
 0x225   :  { %723 = vrot.lane.b32.xlu1 %v1671_v14, %s1562_s7 }
 0x228   :  { %634 = vrot.lane.b32.xlu0 %v1662_v12, %s1561_s6 }
 0x229   :  { %810 = vrot.lane.b32.xlu1 %v1671_v14, %s1563_s8 }
 0x22f   :  { %v1709_v53 = vpop.eup %1495 }
 0x230   :  { %v506_v54 = vsel %vm454_vm1, %v1709_v53, 0.0 }
 0x231   :  { %v1713_v55 = vpop.eup %1497 }
 0x232   :  { %v503_v56 = vsel %vm454_vm1, %v1713_v55, 0.0 }
 0x247   :  { %507 = vadd.xlane.f32.xlu0 %v506_v54 }
 0x24d   :  { %504 = vadd.xlane.f32.xlu1 %v503_v56 }
 0x28f   :  { %v466_v57 = vpop.xlane.xlu0 %465 }
 0x290   :  { %v482_v58 = vsub.f32 %v285_v31, %v466_v57 }
 0x291   :  { %v469_v59 = vpop.xlane.xlu1 %468 }
 0x292   :  { %v493_v60 = vmul.f32 1.442695, %v482_v58  ;;  %v483_v61 = vsub.f32 %v363_v35, %v469_v59 }
 0x293   :  { %v463_v62 = vpop.xlane.xlu0 %462 }
 0x294   :  { %1499 = vpow2.f32 %v493_v60  ;;  %v481_v63 = vsub.f32 %v280_v34, %v463_v62  ;;  %v495_v1 = vmul.f32 1.442695, %v483_v61 }
 0x296   :  { %v491_v3 = vmul.f32 1.442695, %v481_v63 }
 0x297   :  { %v472_v4 = vpop.xlane.xlu0 %471 }
 0x298   :  { %1501 = vpow2.f32 %v491_v3  ;;  %v484_v6 = vsub.f32 %v368_v38, %v472_v4 }
 0x299   :  { %v475_v9 = vpop.xlane.xlu1 %474  ;;  %1503 = vpow2.f32 %v495_v1 }
 0x29a   :  { %v497_v11 = vmul.f32 1.442695, %v484_v6  ;;  %v485_v13 = vsub.f32 %v446_v43, %v475_v9 }
 0x29b   :  { %v478_v14 = vpop.xlane.xlu0 %477 }
 0x29c   :  { %1505 = vpow2.f32 %v497_v11  ;;  %v499_v15 = vmul.f32 1.442695, %v485_v13  ;;  %v486_v16 = vsub.f32 %v451_v42, %v478_v14 }
 0x29d   :  { %v637_v17 = vpop.permute.xlu1 %636 }
 0x29e   :  { %1507 = vpow2.f32 %v499_v15  ;;  %v501_v18 = vmul.f32 1.442695, %v486_v16  ;;  %1421 = vmatprep.subr.mxu1 %v637_v17 }
 0x29f   :  { %v635_v32 = vpop.permute.xlu0 %634 }
 0x2a0   :  { %1509 = vpow2.f32 %v501_v18 }
 0x2a1   :  { %v1717_v19 = vpop.eup %1499  ;;  %v724_v20 = vpop.permute.xlu1 %723 }
 0x2a2   :  { %1428 = vmatprep.subr.mxu0 %v724_v20  ;;  %v512_v21 = vsel %vm454_vm1, %v1717_v19, 0.0 }
 0x2a3   :  { %1429 = vmatpush3.msra.mxu0 %v724_v20  ;;  %513 = vadd.xlane.f32.xlu0 %v512_v21 }
 0x2a5   :  { %v1502_v22 = vpop.eup %1501  ;;  %v811_v34 = vpop.permute.xlu1 %810 }
 0x2a6   :  { %v509_v23 = vsel %vm454_vm1, %v1502_v22, 0.0  ;;  %v1722_v24 = vpop.eup %1503 }
 0x2a7   :  { %510 = vadd.xlane.f32.xlu1 %v509_v23  ;;  %v515_v26 = vsel %vm454_vm1, %v1722_v24, 0.0 }
 0x2a9   :  { %v1724_v25 = vpop.eup %1505 }
 0x2aa   :  { %v518_v27 = vsel %vm454_vm1, %v1724_v25, 0.0 }
 0x2ab   :  { %v1730_v28 = vpop.eup %1507  ;;  %516 = vadd.xlane.f32.xlu1 %v515_v26  ;;  %519 = vadd.xlane.f32.xlu0 %v518_v27 }
 0x2ac   :  { %v521_v30 = vsel %vm454_vm1, %v1730_v28, 0.0 }
 0x2ad   :  { %v1732_v29 = vpop.eup %1509 }
 0x2ae   :  { %v524_v31 = vsel %vm454_vm1, %v1732_v29, 0.0 }
 0x2af   :  { %522 = vadd.xlane.f32.xlu1 %v521_v30  ;;  %525 = vadd.xlane.f32.xlu0 %v524_v31 }
 0x2c0   :  { %808 = vrot.lane.b32.xlu1 %v1662_v12, %s1563_s8 }
 0x2c4   :  { %935 = vrot.lane.b32.xlu1 %v1600_v2, %s1559_s1 }
 0x2c5   :  { %721 = vrot.lane.b32.xlu0 %v1662_v12, %s1562_s7 }
 0x2c8   :  { %933 = vrot.lane.b32.xlu1 %v1609_v5, %s1559_s1 }
 0x2c9   :  { %937 = vrot.lane.b32.xlu0 %v1592_v0, %s1559_s1 }
 0x2d0   :  { %v508_v33 = vpop.xlane.xlu0 %507 }
 0x2d1   :  { %v528_v35 = vmax.f32 %v508_v33, 1e-30 }
 0x2d3   :  { %1511 = vrcp.f32 %v528_v35 }
 0x2d6   :  { %v505_v36 = vpop.xlane.xlu1 %504 }
 0x2d7   :  { %v527_v37 = vmax.f32 %v505_v36, 1e-30 }
 0x2d9   :  { %1513 = vrcp.f32 %v527_v37 }
 0x2e0   :  { %v1512_v38 = vpop.eup %1511 }
 0x2e1   :  { %v538_v12 = vmul.f32 %v1512_v38, %v1709_v53 }
 0x2e6   :  { %v1514_v39 = vpop.eup %1513 }
 0x2e7   :  { %v536_v40 = vmul.f32 %v1514_v39, %v1713_v55 }
 0x2e9   :  { %1418 = vmatprep.mubr.msk.f32.mxu1 %vm454_vm1, %v536_v40 }
 0x2ea   :  { %1419 = vmatmul.mubr.msk.f32.vlgmr.msra.gmra.mxu1 %vm454_vm1, %v538_v12 }
 0x2eb   :  { %1422 = vmatpush3.msra.mxu1 %v637_v17 }
 0x2ec   :  { %1423 = vmatprep.subr.mxu1 %v635_v32 }
 0x2ed   :  { %1424 = vmatpush3.msra.mxu1 %v635_v32 }
 0x2ee   :  { %1435 = vmatprep.subr.mxu1 %v811_v34 }
 0x32c   :  { %v514_v41 = vpop.xlane.xlu0 %513 }
 0x32d   :  { %v530_v42 = vmax.f32 %v514_v41, 1e-30 }
 0x32f   :  { %1515 = vrcp.f32 %v530_v42 }
 0x330   :  { %v511_v43 = vpop.xlane.xlu1 %510 }
 0x331   :  { %v529_v44 = vmax.f32 %v511_v43, 1e-30 }
 0x333   :  { %1517 = vrcp.f32 %v529_v44 }
 0x334   :  { %v517_v45 = vpop.xlane.xlu1 %516  ;;  %v520_v46 = vpop.xlane.xlu0 %519 }
 0x335   :  { %v531_v47 = vmax.f32 %v517_v45, 1e-30  ;;  %v532_v48 = vmax.f32 %v520_v46, 1e-30 }
 0x337   :  { %1519 = vrcp.f32 %v531_v47  ;;  %v30_v47 = vld [vmem:[%s1838_s2 + $0x28] sm:$0xff] }
 0x338   :  { %1521 = vrcp.f32 %v532_v48  ;;  %v523_v49 = vpop.xlane.xlu1 %522  ;;  %v526_v50 = vpop.xlane.xlu0 %525 }
 0x339   :  { %v533_v51 = vmax.f32 %v523_v49, 1e-30  ;;  %v534_v52 = vmax.f32 %v526_v50, 1e-30 }
 0x33b   :  { %1523 = vrcp.f32 %v533_v51 }
 0x33c   :  { %1525 = vrcp.f32 %v534_v52  ;;  %v722_v53 = vpop.permute.xlu0 %721  ;;  %v1516_v54 = vpop.eup %1515 }
 0x33d   :  { %1430 = vmatprep.subr.mxu0 %v722_v53  ;;  %v542_v57 = vmul.f32 %v1516_v54, %v1717_v19  ;;  %v809_v60 = vpop.permute.xlu1 %808 }
 0x33e   :  { %1431 = vmatpush3.msra.mxu0 %v722_v53 }
 0x340   :  { %v1518_v55 = vpop.eup %1517  ;;  %v938_v6 = vpop.permute.xlu0 %937 }
 0x341   :  { %v540_v56 = vmul.f32 %v1518_v55, %v1502_v22  ;;  %v936_v9 = vpop.permute.xlu1 %935  ;;  %1442 = vmatprep.subr.mxu0 %v938_v6 }
 0x343   :  { %1425 = vmatprep.mubr.msk.f32.mxu1 %vm454_vm1, %v540_v56  ;;  %v1053_v56 = vlaneseq }
 0x344   :  { %v1520_v58 = vpop.eup %1519  ;;  %1426 = vmatmul.mubr.msk.f32.vlgmr.msra.gmra.mxu1 %vm454_vm1, %v542_v57 }
 0x345   :  { %v1522_v59 = vpop.eup %1521  ;;  %1436 = vmatpush3.msra.mxu1 %v811_v34  ;;  %v544_v61 = vmul.f32 %v1520_v58, %v1722_v24  ;;  %v934_v11 = vpop.permute.xlu1 %933  ;;  %v1054_v58 = vshrl.u32 %v1053_v56, 7 }
 0x346   :  { %1437 = vmatprep.subr.mxu1 %v809_v60  ;;  %v546_v62 = vmul.f32 %v1522_v59, %v1724_v25 }
 0x347   :  { %1438 = vmatpush3.msra.mxu1 %v809_v60  ;;  %1432 = vmatprep.mubr.msk.f32.mxu0 %vm454_vm1, %v544_v61  ;;  %v1055_v59 = vsub.s32 2, %v1054_v58  ;;  %v33_v60 = vld [vmem:[%s1838_s2 + $0x40] sm:$0xf] }
 0x348   :  { %v1524_v63 = vpop.eup %1523  ;;  %1433 = vmatmul.mubr.msk.f32.vlgmr.msra.gmra.mxu0 %vm454_vm1, %v546_v62 }
 0x349   :  { %v1526_v1 = vpop.eup %1525  ;;  %v548_v3 = vmul.f32 %v1524_v63, %v1730_v28  ;;  %1443 = vmatpush3.msra.mxu0 %v938_v6  ;;  %v1800_v63 = vrot.slane %v33_v60, %v1055_v59 }
 0x34a   :  { %v550_v4 = vmul.f32 %v1526_v1, %v1732_v29  ;;  %1444 = vmatprep.subr.mxu0 %v936_v9  ;;  %v1061_v1 = vsub.s32 3, %v1054_v58 }
 0x34b   :  { %1439 = vmatprep.mubr.msk.f32.mxu1 %vm454_vm1, %v548_v3  ;;  %1445 = vmatpush3.msra.mxu0 %v936_v9 }
 0x34c   :  { %1440 = vmatmul.mubr.msk.f32.vlgmr.msra.gmra.mxu1 %vm454_vm1, %v550_v4  ;;  %1446 = vmatprep.subr.mxu0 %v934_v11  ;;  %v1802_v6 = vrot.slane %v33_v60, %v1061_v1 }
 0x34d   :  { %1447 = vmatpush3.msra.mxu0 %v934_v11 }
 0x3aa   :  { %v1420_v13 = vpop.f32.mrf.mxu1 }
 0x3ac   :  { %v623_v14 = vpop.f32.mrf.mxu1 }
 0x404   :  { %v1427_v15 = vpop.f32.mrf.mxu1 }
 0x405   :  { %899 = vrot.lane.b32.xlu0 %v1427_v15, %s1564_s9  ;;  %v28_v15 = vld [vmem:[%s1838_s2 + $0x18] sm:$0xff] }
 0x406   :  { %v712_v17 = vpop.f32.mrf.mxu1 }
 0x408   :  { %v1434_v16 = vpop.f32.mrf.mxu0 }
 0x409   :  { %907 = vrot.lane.b32.xlu0 %v1434_v16, %s1565_s10  ;;  %v27_v16 = vld [vmem:[%s1838_s2 + $0x10] sm:$0xff] }
 0x40a   :  { %v799_v18 = vpop.f32.mrf.mxu0 }
 0x40b   :  { %905 = vrot.lane.b32.xlu1 %v799_v18, %s1565_s10  ;;  %v25_v18 = vld [vmem:[%s1838_s2] sm:$0xff] }
 0x40c   :  { %v1441_v19 = vpop.f32.mrf.mxu1 }
 0x40d   :  { %897 = vrot.lane.b32.xlu0 %v712_v17, %s1564_s9  ;;  %v26_v17 = vld [vmem:[%s1838_s2 + $0x8] sm:$0xff] }
 0x40e   :  { %v886_v20 = vpop.f32.mrf.mxu1 }
 0x40f   :  { %913 = vrot.lane.b32.xlu1 %v886_v20, %s1566_s11 }
 0x411   :  { %931 = vrot.lane.b32.xlu0 %v1623_v8, %s1559_s1 }
 0x413   :  { %915 = vrot.lane.b32.xlu1 %v1441_v19, %s1566_s11  ;;  %v1067_v19 = vsub.s32 0, %v1054_v58 }
 0x415   :  { %v1068_v20 = vrot.slane %v33_v60, %v1067_v19 }
 0x477   :  { %v900_v21 = vpop.permute.xlu0 %899 }
 0x478   :  { %v921_v30 = vsel %vm919_vm2, %v1420_v13, %v900_v21 }
 0x47b   :  { %v908_v22 = vpop.permute.xlu0 %907 }
 0x47c   :  { %v923_v31 = vsel %vm454_vm1, %v921_v30, %v908_v22 }
 0x47d   :  { %v906_v23 = vpop.permute.xlu1 %905 }
 0x47f   :  { %v898_v24 = vpop.permute.xlu0 %897 }
 0x480   :  { %v920_v25 = vsel %vm919_vm2, %v623_v14, %v898_v24 }
 0x481   :  { %v914_v26 = vpop.permute.xlu1 %913  ;;  %v922_v27 = vsel %vm454_vm1, %v920_v25, %v906_v23 }
 0x482   :  { %v925_v28 = vsel %vm924_vm3, %v922_v27, %v914_v26  ;;  %v1166_v27 = vsub.s32 1, %v1054_v58 }
 0x483   :  { %1450 = vmatprep.mubr.msk.f32.mxu0 %vm34_vm0, %v925_v28  ;;  %v932_v29 = vpop.permute.xlu0 %931 }
 0x484   :  { %1448 = vmatprep.subr.mxu0 %v932_v29  ;;  %v1167_v28 = vrot.slane %v33_v60, %v1166_v27 }
 0x485   :  { %v916_v32 = vpop.permute.xlu1 %915  ;;  %1449 = vmatpush3.msra.mxu0 %v932_v29 }
 0x486   :  { %v926_v33 = vsel %vm924_vm3, %v923_v31, %v916_v32 }
 0x487   :  { %1451 = vmatmul.mubr.msk.f32.vlgmr.msra.gmra.mxu0 %vm34_vm0, %v926_v33 }
 0x547   :  { %v1452_v34 = vpop.f32.mrf.mxu0 }
 0x548   :  { %v1025_v35 = vadd.f32 %v1452_v34, %v1618_v7 }
 0x549   :  { %v1015_v36 = vpop.f32.mrf.mxu0 }
 0x54a   :  { %v1024_v37 = vadd.f32 %v1015_v36, %v1634_v10  ;;  %v1029_v38 = vsel %vm34_vm0, %v1025_v35, 0.0 }
 0x54b   :  { %1030 = vadd.xlane.f32.xlu1 %v1029_v38 }
 0x54c   :  { %v1026_v39 = vsel %vm34_vm0, %v1024_v37, 0.0 }
 0x54d   :  { %1027 = vadd.xlane.f32.xlu0 %v1026_v39 }
 0x55c   :  { %1075 = vrot.lane.b32.xlu1 %v1592_v0, %s1558_s0 }
 0x560   :  { %1071 = vrot.lane.b32.xlu1 %v1609_v5, %s1558_s0  ;;  %v32_v5 = vld [vmem:[%s1838_s2 + $0x38] sm:$0xff] }
 0x561   :  { %1464 = vmatprep.subr.mxu0 %v32_v5 }
 0x562   :  { %1465 = vmatpush3.msra.mxu0 %v32_v5 }
 0x564   :  { %1069 = vrot.lane.b32.xlu1 %v1623_v8, %s1558_s0  ;;  %v31_v8 = vld [vmem:[%s1838_s2 + $0x30] sm:$0xff] }
 0x565   :  { %1466 = vmatprep.subr.mxu0 %v31_v8 }
 0x566   :  { %1467 = vmatpush3.msra.mxu0 %v31_v8 }
 0x567   :  { %1468 = vmatprep.subr.mxu0 %v30_v47 }
 0x568   :  { %1469 = vmatpush3.msra.mxu0 %v30_v47 }
 0x5d4   :  { %v1031_v40 = vpop.xlane.xlu1 %1030 }
 0x5d5   :  { %v1034_v7 = vmul.f32 0.03125, %v1031_v40 }
 0x5d6   :  { %v1028_v12 = vpop.xlane.xlu0 %1027 }
 0x5d7   :  { %v1036_v41 = vsub.f32 %v1025_v35, %v1034_v7  ;;  %v1033_v10 = vmul.f32 0.03125, %v1028_v12 }
 0x5d8   :  { %v1076_v0 = vpop.permute.xlu1 %1075 }
 0x5d9   :  { %v1035_v42 = vsub.f32 %v1024_v37, %v1033_v10  ;;  %v1038_v43 = vmul.f32 %v1036_v41, %v1036_v41  ;;  %1453 = vmatprep.subr.mxu1 %v1076_v0 }
 0x5da   :  { %1454 = vmatpush3.msra.mxu1 %v1076_v0 }
 0x5db   :  { %v1042_v44 = vsel %vm34_vm0, %v1038_v43, 0.0  ;;  %v1037_v45 = vmul.f32 %v1035_v42, %v1035_v42 }
 0x5dc   :  { %1043 = vadd.xlane.f32.xlu0 %v1042_v44  ;;  %v1072_v52 = vpop.permute.xlu1 %1071 }
 0x5dd   :  { %v1039_v46 = vsel %vm34_vm0, %v1037_v45, 0.0 }
 0x5e0   :  { %1040 = vadd.xlane.f32.xlu0 %v1039_v46  ;;  %v1070_v57 = vpop.permute.xlu1 %1069 }
 0x5f6   :  { %1073 = vrot.lane.b32.xlu0 %v1600_v2, %s1558_s0  ;;  %v29_v2 = vld [vmem:[%s1838_s2 + $0x20] sm:$0xff]  ;;  %s1567_s2 = smov [#allocation2]  }
 0x5f7   :  { %1470 = vmatprep.subr.mxu0 %v29_v2  ;;  %s1289_s30 = sshll.u32 %s1567_s2, 4  ;;  %s1290_s30 = int_to_ptr.vmem [resolvable:$true] %s1289_s30 }
 0x5f8   :  { %1471 = vmatpush3.msra.mxu0 %v29_v2  ;;  %s1535_s4 = scalar_lea.vmem %s1290_s30, 256  ;;  %p1540_p1 = scmp.lt.s32.totalorder %s1290_s30, %s1290_s30 }
 0x5f9   :  { %1472 = vmatprep.subr.mxu0 %v28_v15  ;;  %p1536_p0 = scmp.ne.s32.totalorder %s1290_s30, %s1535_s4  ;;  %p1541_p2 = scmp.lt.s32.totalorder %s1535_s4, %s1535_s4 }
 0x5fa   :  { %1473 = vmatpush3.msra.mxu0 %v28_v15 }
 0x5fb   :  { %1474 = vmatprep.subr.mxu0 %v27_v16  ;;  %p1542_p3 = por %p1541_p2, %p1540_p1 }
 0x5fc   :  { %1475 = vmatpush3.msra.mxu0 %v27_v16 }
 0x5fd   :  { %1476 = vmatprep.subr.mxu0 %v26_v17  ;;  %p1543_p4 = pnand %p1542_p3, %p1536_p0 }
 0x5fe   :  { %1477 = vmatpush3.msra.mxu0 %v26_v17 }
 0x5ff   :  { %1478 = vmatprep.subr.mxu0 %v25_v18 }
 0x600   :  { %1479 = vmatpush3.msra.mxu0 %v25_v18 }
 0x665   :  { %v1044_v48 = vpop.xlane.xlu0 %1043 }
 0x666   :  { %v1046_v49 = vmul.f32 0.03125, %v1044_v48 }
 0x668   :  { %v1048_v50 = vadd.f32 1e-05, %v1046_v49 }
 0x669   :  { %v1041_v51 = vpop.xlane.xlu0 %1040 }
 0x66a   :  { %1527 = vrsqrt.f32 %v1048_v50  ;;  %v1045_v53 = vmul.f32 0.03125, %v1041_v51 }
 0x66c   :  { %v1047_v54 = vadd.f32 1e-05, %v1045_v53 }
 0x66d   :  { %v1074_v55 = vpop.permute.xlu0 %1073 }
 0x66e   :  { %1529 = vrsqrt.f32 %v1047_v54  ;;  %1455 = vmatprep.subr.mxu1 %v1074_v55 }
 0x66f   :  { %1456 = vmatpush3.msra.mxu1 %v1074_v55 }
 0x670   :  { %1457 = vmatprep.subr.mxu1 %v1072_v52 }
 0x671   :  { %1458 = vmatpush3.msra.mxu1 %v1072_v52 }
 0x672   :  { %1459 = vmatprep.subr.mxu1 %v1070_v57 }
 0x673   :  { %1460 = vmatpush3.msra.mxu1 %v1070_v57 }
 0x677   :  { %v1528_v61 = vpop.eup %1527 }
 0x678   :  { %v1052_v62 = vmul.f32 %v1528_v61, %v1036_v41 }
 0x67a   :  { %v1058_v9 = vmul.f32 %v1800_v63, %v1052_v62 }
 0x67b   :  { %v1530_v3 = vpop.eup %1529 }
 0x67c   :  { %v1051_v4 = vmul.f32 %v1530_v3, %v1035_v42  ;;  %v1064_v14 = vadd.f32 %v1802_v6, %v1058_v9 }
 0x67e   :  { %v1057_v11 = vmul.f32 %v1800_v63, %v1051_v4 }
 0x680   :  { %v1063_v13 = vadd.f32 %v1802_v6, %v1057_v11 }
 0x682   :  { %1461 = vmatprep.mubr.msk.f32.mxu1 %vm34_vm0, %v1063_v13 }
 0x683   :  { %1462 = vmatmul.mubr.msk.f32.vlgmr.msra.gmra.mxu1 %vm34_vm0, %v1064_v14 }
 0x743   :  { %v1463_v21 = vpop.f32.mrf.mxu1 }
 0x744   :  { %v1159_v22 = vadd.f32 %v1463_v21, %v1068_v20 }
 0x745   :  { %v1153_v23 = vpop.f32.mrf.mxu1 }
 0x746   :  { %v1154_v24 = vadd.f32 %v1153_v23, %v1068_v20  ;;  %v1163_v26 = vmax.f32 %v1159_v22, 0.0 }
 0x748   :  { %v1162_v25 = vmax.f32 %v1154_v24, 0.0 }
 0x74a   :  { %1480 = vmatprep.mubr.msk.f32.mxu0 %vm1168_vm4, %v1162_v25 }
 0x74b   :  { %1481 = vmatmul.mubr.msk.f32.vlgmr.msra.gmra.mxu0 %vm1168_vm4, %v1163_v26 }
 0x80b   :  { %v1482_v29 = vpop.f32.mrf.mxu0 }
 0x80c   :  { %v1247_v30 = vadd.f32 %v1482_v29, %v1167_v28 }
 0x80d   :  { %v1241_v31 = vpop.f32.mrf.mxu0 }
 0x80e   :  { %v1242_v32 = vadd.f32 %v1241_v31, %v1167_v28  ;;  %v1251_v33 = vadd.f32 %v1247_v30, %v1064_v14 }
 0x810   :  { %v1255_v34 = vsel %vm34_vm0, %v1251_v33, 0.0  ;;  %v1250_v35 = vadd.f32 %v1242_v32, %v1063_v13 }
 0x811   :  { %1256 = vadd.xlane.f32.xlu1 %v1255_v34 }
 0x812   :  { %v1252_v36 = vsel %vm34_vm0, %v1250_v35, 0.0 }
 0x813   :  { %1253 = vadd.xlane.f32.xlu0 %v1252_v36 }
 0x89a   :  { %v1257_v37 = vpop.xlane.xlu1 %1256 }
 0x89b   :  { %v1259_v38 = vmul.f32 0.03125, %v1257_v37 }
 0x89c   :  { %v1254_v39 = vpop.xlane.xlu0 %1253 }
 0x89d   :  { %v1258_v40 = vmul.f32 0.03125, %v1254_v39  ;;  %v1261_v7 = vsub.f32 %v1251_v33, %v1259_v38 }
 0x89f   :  { %v1260_v12 = vsub.f32 %v1250_v35, %v1258_v40  ;;  %v1263_v42 = vmul.f32 %v1261_v7, %v1261_v7 }
 0x8a1   :  { %v1262_v41 = vmul.f32 %v1260_v12, %v1260_v12  ;;  %v1267_v43 = vsel %vm34_vm0, %v1263_v42, 0.0 }
 0x8a3   :  { %v1264_v10 = vsel %vm34_vm0, %v1262_v41, 0.0 }
 0x8a4   :  { %1265 = vadd.xlane.f32.xlu0 %v1264_v10 }
 0x8a8   :  { %1268 = vadd.xlane.f32.xlu0 %v1267_v43 }
 0x92d   :  { %v1266_v44 = vpop.xlane.xlu0 %1265 }
 0x92e   :  { %v1270_v45 = vmul.f32 0.03125, %v1266_v44 }
 0x930   :  { %v1272_v46 = vadd.f32 1e-05, %v1270_v45 }
 0x931   :  { %v1269_v0 = vpop.xlane.xlu0 %1268 }
 0x932   :  { %1531 = vrsqrt.f32 %v1272_v46  ;;  %v1271_v5 = vmul.f32 0.03125, %v1269_v0 }
 0x934   :  { %v1273_v8 = vadd.f32 1e-05, %v1271_v5 }
 0x936   :  { %1533 = vrsqrt.f32 %v1273_v8 }
 0x93f   :  { %v1532_v47 = vpop.eup %1531 }
 0x940   :  { %v1276_v2 = vmul.f32 %v1532_v47, %v1260_v12 }
 0x942   :  { %v1278_v48 = vmul.f32 %v1276_v2, %v1800_v63 }
 0x943   :  { %v1534_v49 = vpop.eup %1533 }
 0x944   :  { %v1277_v50 = vmul.f32 %v1534_v49, %v1261_v7  ;;  %v1280_v51 = vadd.f32 %v1278_v48, %v1802_v6 }
 0x946   :  { %v1279_v52 = vmul.f32 %v1277_v50, %v1800_v63  ;;  %1282 = vst.msk [vmem:[#allocation2] sm:$0xff] %vm34_vm0, %v1280_v51 }
 0x948   :  { %v1281_v53 = vadd.f32 %v1279_v52, %v1802_v6 }
 0x94a   :  { %1283 = vst.msk [vmem:[#allocation2 + $0x8] sm:$0xff] %vm34_vm0, %v1281_v53 }
 0x94b   :  { %1546 = shalt.err (!%p1543_p4)
}
 0x94c   :  { %s1568_s0 = smov 128  }
 0x94d   :  { %1295 = dma.vmem_to_hbm [thread:$0]  %s1290_s30, 256, %s1839_s3, [#allocation3], %s1568_s0, %s1568_s0, %s1564_s9  }
 0x94e   :  { %1555 = dma.done.wait [#allocation3], 256  }
 0x94f   :  { %1556 = vsyncadd [#allocation3], 4294967040 }
 0x950   :  { %1299 = vsyncpa [#allocation3], 1 }

</bundles_post_ra>
